<compile_context>
chip_gen: v5e
topology: v5e:2x2
jax: 0.10.0
libtpu: 0.0.40
codegen_flags: <defaults>
</compile_context>

<pallas_src>
import functools

import jax
import jax.numpy as jnp
from jax.experimental import pallas as pl
from jax.experimental.pallas import tpu as pltpu

LEAKY_SLOPE = 0.01  # PyTorch nn.LeakyReLU default negative_slope


def _round_up(v, m):
    return ((v + m - 1) // m) * m


def _mlp_kernel(num_layers, *refs):
    """Fused MLP forward for one batch tile.

    refs = (x_ref, w0_ref, b0_ref, ..., w{L-1}_ref, b{L-1}_ref, o_ref)
    Matmuls run on the MXU in the operands' native dtype with f32 accumulation;
    bias-add + LeakyReLU stay in f32 on the VPU (cheap, exact on v5e too).
    """
    x_ref = refs[0]
    o_ref = refs[-1]
    param_refs = refs[1:-1]
    compute_dtype = x_ref.dtype

    h = x_ref[...]  # native dtype (f32 or bf16) straight to the MXU, no upcast
    for layer in range(num_layers):
        w = param_refs[2 * layer][...]
        b = param_refs[2 * layer + 1][...].astype(jnp.float32)   # (1, out_p)
        acc = jnp.dot(h, w, preferred_element_type=jnp.float32) + b
        if layer < num_layers - 1:
            acc = jnp.where(acc > 0, acc, LEAKY_SLOPE * acc)     # LeakyReLU, f32 VPU
            h = acc.astype(compute_dtype)
        else:
            o_ref[...] = acc.astype(o_ref.dtype)


def encoder_mlp_forward(x, params, *, tb_target=128, compute_dtype=None):
    """Run the fused EncoderMLP kernel.

    x: [B, C, H, W] (or already [B, n_in]); params: list of (W [in, out], b [out])
    in torch-Linear order (W already transposed vs. nn.Linear.weight).
    compute_dtype: dtype fed to the MXU (e.g. jnp.bfloat16); default = x.dtype.
    """
    B = x.shape[0]
    x2d = x.reshape(B, -1)                 # nn.Flatten(): row-major flatten
    out_dtype = x.dtype
    if compute_dtype is None:
        compute_dtype = x2d.dtype

    num_layers = len(params)
    n_in = x2d.shape[1]
    n_out = params[-1][0].shape[1]

    # ---- lane padding: every feature dim -> multiple of 128 ----------------
    dims = [n_in] + [w.shape[1] for (w, _) in params]
    dims_p = [_round_up(d, 128) for d in dims]
    n_in_p, n_out_p = dims_p[0], dims_p[-1]

    padded_params = []
    for li, (w, b) in enumerate(params):
        in_p, out_p = dims_p[li], dims_p[li + 1]
        w_p = jnp.pad(w, ((0, in_p - w.shape[0]), (0, out_p - w.shape[1])))
        b_p = jnp.pad(b, (0, out_p - b.shape[0])).reshape(1, -1)  # zero pad ->
        # padded lanes stay exactly 0 through LeakyReLU (LeakyReLU(0)=0).
        padded_params.append((w_p.astype(compute_dtype), b_p.astype(jnp.float32)))

    # ---- batch padding / tiling: sublane-aligned, tb<=tb_target -------------
    tb = min(tb_target, _round_up(B, 8))
    B_p = _round_up(B, tb)
    if n_in_p != n_in or B_p != B:
        x2d = jnp.pad(x2d, ((0, B_p - B), (0, n_in_p - n_in)))
    x2d = x2d.astype(compute_dtype)
    grid = (B_p // tb,)

    # ---- block specs ---------------------------------------------------------
    in_specs = [pl.BlockSpec((tb, n_in_p), lambda i: (i, 0))]   # pipelined activ.
    kernel_args = [x2d]
    for (w_p, b_p) in padded_params:
        in_specs.append(pl.BlockSpec(w_p.shape, lambda i: (0, 0)))   # resident
        in_specs.append(pl.BlockSpec(b_p.shape, lambda i: (0, 0)))   # resident
        kernel_args.append(w_p)
        kernel_args.append(b_p)
    out_spec = pl.BlockSpec((tb, n_out_p), lambda i: (i, 0))

    # ---- VMEM budget (v7x: 64 MiB total, 32 MiB default scoped) -------------
    act_itemsize = jnp.dtype(compute_dtype).itemsize
    param_bytes = sum(w.size * w.dtype.itemsize + b.size * b.dtype.itemsize
                      for (w, b) in padded_params)
    vmem_est = (2 * tb * n_in_p * act_itemsize                  # double-buffered in
                + 2 * tb * n_out_p * jnp.dtype(out_dtype).itemsize   # d-buffered out
                + param_bytes)
    vmem_limit = None
    if vmem_est > 32 * 1024 * 1024:
        vmem_limit = min(int(vmem_est * 1.5), 64 * 1024 * 1024)  # keep v7x headroom
    # TODO(synk): if W0 alone overflows the VMEM budget (huge n_in), add a K grid
    # axis for layer 0 with an f32 accumulator scratch instead of failing here.

    # ---- cost estimate -------------------------------------------------------
    flops = 2 * B_p * sum(dims_p[i] * dims_p[i + 1] for i in range(num_layers))
    bytes_accessed = (x2d.size * act_itemsize + param_bytes
                      + B_p * n_out_p * jnp.dtype(out_dtype).itemsize)
    cost = pl.CostEstimate(flops=flops, transcendentals=0,
                           bytes_accessed=bytes_accessed)

    kernel = functools.partial(_mlp_kernel, num_layers)
    out_p = pl.pallas_call(
        kernel,
        out_shape=jax.ShapeDtypeStruct((B_p, n_out_p), out_dtype),
        grid=grid,
        in_specs=in_specs,
        out_specs=out_spec,
        compiler_params=pltpu.CompilerParams(
            dimension_semantics=("parallel",),      # batch axis -> both TCs on v7x
            vmem_limit_bytes=vmem_limit,
        ),
        cost_estimate=cost,
    )(*kernel_args)

    return out_p[:B, :n_out]


def init_encoder_mlp_params(key, n_in, n_out, n_hid, n_layers=2,
                            double_n_out=True, dtype=jnp.float32):
    """nn.Linear-style init: U[-1/sqrt(fan_in), 1/sqrt(fan_in)] for W and b."""
    n_out_eff = n_out * 2 if double_n_out else n_out
    dims = [n_in] + [n_hid] * (n_layers - 1) + [n_out_eff]
    params = []
    for fan_in, fan_out in zip(dims[:-1], dims[1:]):
        key, kw, kb = jax.random.split(key, 3)
        bound = 1.0 / (fan_in ** 0.5)
        w = jax.random.uniform(kw, (fan_in, fan_out), dtype, -bound, bound)
        b = jax.random.uniform(kb, (fan_out,), dtype, -bound, bound)
        params.append((w, b))
    return params


def encoder_mlp_reference(x, params):
    """Plain-JAX f32 reference for correctness checking."""
    h = x.reshape(x.shape[0], -1).astype(jnp.float32)
    for i, (w, b) in enumerate(params):
        h = h @ w.astype(jnp.float32) + b.astype(jnp.float32)
        if i < len(params) - 1:
            h = jnp.where(h > 0, h, LEAKY_SLOPE * h)
    return h.astype(x.dtype)


if __name__ == "__main__":
    key = jax.random.PRNGKey(0)
    k_x, k_p = jax.random.split(key)

    # Small shapes: x is NCHW [2, 4, 16, 16] -> n_in = 4*16*16 = 1024
    B, C, H, W = 2, 4, 16, 16
    n_in = C * H * W
    n_hid = 32
    n_out = 8          # doubled to 16 by double_n_out=True
    n_layers = 2

    x = jax.random.normal(k_x, (B, C, H, W), dtype=jnp.float32)
    params = init_encoder_mlp_params(k_p, n_in, n_out, n_hid,
                                     n_layers=n_layers, double_n_out=True)
    ref = encoder_mlp_reference(x, params)

    # f32 path (exact vs reference)
    out = jax.block_until_ready(encoder_mlp_forward(x, params))
    assert out.shape == (B, n_out * 2), out.shape
    assert jnp.allclose(out, ref, atol=1e-4, rtol=1e-4), "f32 mismatch vs reference"

    # bf16-fed MXU path (f32 accumulation), loose tolerance vs f32 reference
    out_bf16 = jax.block_until_ready(
        encoder_mlp_forward(x, params, compute_dtype=jnp.bfloat16))
    assert out_bf16.shape == (B, n_out * 2), out_bf16.shape
    assert jnp.allclose(out_bf16.astype(jnp.float32), ref, atol=0.15, rtol=0.15), \
        "bf16 mismatch vs reference"

    print("KERNEL_OK")
</pallas_src>

<mosaic_0001>
module attributes {stable_mosaic.version = 11 : i64} {
  func.func @_mlp_kernel(%arg0: i32, %arg1: memref<8x1024xf32, #tpu.memory_space<vmem>>, %arg2: memref<1024x128xf32, #tpu.memory_space<vmem>>, %arg3: memref<1x128xf32, #tpu.memory_space<vmem>>, %arg4: memref<128x128xf32, #tpu.memory_space<vmem>>, %arg5: memref<1x128xf32, #tpu.memory_space<vmem>>, %arg6: memref<8x128xf32, #tpu.memory_space<vmem>>) attributes {dimension_semantics = [#tpu.dimension_semantics<parallel>], iteration_bounds = array<i64: 1>, scalar_prefetch = 0 : i64, scratch_operands = 0 : i64, tpu.core_type = #tpu.core_type<tc>, window_params = [{transform_indices = @transform_0, window_bounds = array<i64: 8, 1024>}, {pipeline_mode = #tpu.pipeline_mode<synchronous>, transform_indices = @transform_1, window_bounds = array<i64: 1024, 128>}, {pipeline_mode = #tpu.pipeline_mode<synchronous>, transform_indices = @transform_2, window_bounds = array<i64: 1, 128>}, {pipeline_mode = #tpu.pipeline_mode<synchronous>, transform_indices = @transform_3, window_bounds = array<i64: 128, 128>}, {pipeline_mode = #tpu.pipeline_mode<synchronous>, transform_indices = @transform_4, window_bounds = array<i64: 1, 128>}, {transform_indices = @transform_5, window_bounds = array<i64: 8, 128>}]} {
    %c0 = arith.constant 0 : index
    %c0_0 = arith.constant 0 : index
    %0 = vector.load %arg1[%c0, %c0_0] : memref<8x1024xf32, #tpu.memory_space<vmem>>, vector<8x1024xf32>
    %c0_1 = arith.constant 0 : index
    %c0_2 = arith.constant 0 : index
    %1 = vector.load %arg2[%c0_1, %c0_2] : memref<1024x128xf32, #tpu.memory_space<vmem>>, vector<1024x128xf32>
    %c0_3 = arith.constant 0 : index
    %c0_4 = arith.constant 0 : index
    %2 = vector.load %arg3[%c0_3, %c0_4] : memref<1x128xf32, #tpu.memory_space<vmem>>, vector<1x128xf32>
    %cst = arith.constant dense<0.000000e+00> : vector<8x128xf32>
    %3 = tpu.matmul %0, %1, %cst {dimension_numbers = #tpu.dot_dimension_numbers<[1], [0], [0], [1], [0, 0, 1, 1], [], []>} : vector<8x1024xf32>, vector<1024x128xf32>, vector<8x128xf32> -> vector<8x128xf32>
    %4 = vector.broadcast %2 : vector<1x128xf32> to vector<8x128xf32>
    %5 = arith.addf %3, %4 : vector<8x128xf32>
    %cst_5 = arith.constant 0.000000e+00 : f32
    %6 = vector.broadcast %cst_5 : f32 to vector<8x128xf32>
    %7 = arith.cmpf ogt, %5, %6 : vector<8x128xf32>
    %cst_6 = arith.constant 0.00999999977 : f32
    %8 = vector.broadcast %cst_6 : f32 to vector<8x128xf32>
    %9 = arith.mulf %8, %5 : vector<8x128xf32>
    %10 = arith.select %7, %5, %9 : vector<8x128xi1>, vector<8x128xf32>
    %c0_7 = arith.constant 0 : index
    %c0_8 = arith.constant 0 : index
    %11 = vector.load %arg4[%c0_7, %c0_8] : memref<128x128xf32, #tpu.memory_space<vmem>>, vector<128x128xf32>
    %c0_9 = arith.constant 0 : index
    %c0_10 = arith.constant 0 : index
    %12 = vector.load %arg5[%c0_9, %c0_10] : memref<1x128xf32, #tpu.memory_space<vmem>>, vector<1x128xf32>
    %cst_11 = arith.constant dense<0.000000e+00> : vector<8x128xf32>
    %13 = tpu.matmul %10, %11, %cst_11 {dimension_numbers = #tpu.dot_dimension_numbers<[1], [0], [0], [1], [0, 0, 1, 1], [], []>} : vector<8x128xf32>, vector<128x128xf32>, vector<8x128xf32> -> vector<8x128xf32>
    %14 = vector.broadcast %12 : vector<1x128xf32> to vector<8x128xf32>
    %15 = arith.addf %13, %14 : vector<8x128xf32>
    %c0_12 = arith.constant 0 : index
    %c0_13 = arith.constant 0 : index
    %16 = vector.load %arg6[%c0_12, %c0_13] : memref<8x128xf32, #tpu.memory_space<vmem>>, vector<8x128xf32>
    tpu.vector_store %arg6[%c0_12, %c0_13], %15 {strides = array<i32>} : memref<8x128xf32, #tpu.memory_space<vmem>>, vector<8x128xf32>,
    return
  }
  func.func @transform_0(%arg0: i32) -> (i32, i32) {
    %c0_i32 = arith.constant 0 : i32
    %c0_i32_0 = arith.constant 0 : i32
    return %arg0, %c0_i32 : i32, i32
  }
  func.func @transform_1(%arg0: i32) -> (i32, i32) {
    %c0_i32 = arith.constant 0 : i32
    %c0_i32_0 = arith.constant 0 : i32
    %c0_i32_1 = arith.constant 0 : i32
    return %c0_i32, %c0_i32_0 : i32, i32
  }
  func.func @transform_2(%arg0: i32) -> (i32, i32) {
    %c0_i32 = arith.constant 0 : i32
    %c0_i32_0 = arith.constant 0 : i32
    %c0_i32_1 = arith.constant 0 : i32
    return %c0_i32, %c0_i32_0 : i32, i32
  }
  func.func @transform_3(%arg0: i32) -> (i32, i32) {
    %c0_i32 = arith.constant 0 : i32
    %c0_i32_0 = arith.constant 0 : i32
    %c0_i32_1 = arith.constant 0 : i32
    return %c0_i32, %c0_i32_0 : i32, i32
  }
  func.func @transform_4(%arg0: i32) -> (i32, i32) {
    %c0_i32 = arith.constant 0 : i32
    %c0_i32_0 = arith.constant 0 : i32
    %c0_i32_1 = arith.constant 0 : i32
    return %c0_i32, %c0_i32_0 : i32, i32
  }
  func.func @transform_5(%arg0: i32) -> (i32, i32) {
    %c0_i32 = arith.constant 0 : i32
    %c0_i32_0 = arith.constant 0 : i32
    return %arg0, %c0_i32 : i32, i32
  }
}

</mosaic_0001>

<bundles_post_ra>
// kernel: tpu_custom_call.1
= control target key start
LH: loop header
LB: loop body
LE: loop exit
PB: predicated region body
PF: predicated region fallthrough
CT: control target
= control target key end

     0   :  { %10 = vsyncpa [#allocation3], 0  ;;  %s592_s0 = inlined_call_operand.hbm [shape: f32[8,1024], index: 0, kind: input, shape index: {}]   ;;  %s593_s1 = inlined_call_operand.hbm [shape: f32[1024,128], index: 1, kind: input, shape index: {}]   ;;  %s594_s2 = inlined_call_operand.vmem [shape: f32[1,128], index: 2, kind: input, shape index: {}]   ;;  %s595_s3 = inlined_call_operand.hbm [shape: f32[128,128], index: 3, kind: input, shape index: {}]   ;;  %s596_s4 = inlined_call_operand.vmem [shape: f32[1,128], index: 4, kind: input, shape index: {}]   ;;  %s597_s5 = inlined_call_operand.hbm [shape: f32[8,128], index: 5, kind: output, shape index: {}]  }
   0x1   :  { %11 = vsyncpa [#allocation6], 0  ;;  %s28_s20 = sshll.u32 %s593_s1, 4  ;;  %s29_s20 = int_to_ptr.hbm [resolvable:$true] %s28_s20 }
   0x2   :  { %12 = vsyncpa [#allocation4], 0  ;;  %s538_s21 = smov [#allocation5]   ;;  %s18_s25 = sshll.u32 %s592_s0, 4  ;;  %s19_s25 = int_to_ptr.hbm [resolvable:$true] %s18_s25 }
   0x3   :  { %s30_s22 = sshll.u32 %s538_s21, 4  ;;  %s539_s26 = smov 128   ;;  %s31_s22 = int_to_ptr.vmem [resolvable:$true] %s30_s22 }
   0x4   :  { %s540_s27 = smov 8   ;;  %s541_s28 = smov [#allocation2]  }
   0x5   :  { %36 = dma.hbm_to_vmem [thread:$0]  %s29_s20, 16384, %s31_s22, [#allocation6], %s539_s26, %s539_s26, %s540_s27  }
   0x6   :  { %s20_s29 = sshll.u32 %s541_s28, 4  ;;  %s43_s7 = sshll.u32 %s595_s3, 4  ;;  %s21_s29 = int_to_ptr.vmem [resolvable:$true] %s20_s29  ;;  %s44_s7 = int_to_ptr.hbm [resolvable:$true] %s43_s7 }
   0x7   :  { %23 = dma.hbm_to_vmem [thread:$0]  %s19_s25, 1024, %s21_s29, [#allocation3]  }
   0x8   :  { %s542_s1 = smov [#allocation7]  }
   0x9   :  { %s45_s8 = sshll.u32 %s542_s1, 4  ;;  %s46_s8 = int_to_ptr.vmem [resolvable:$true] %s45_s8 }
   0xa   :  { %51 = dma.hbm_to_vmem [thread:$0]  %s44_s7, 2048, %s46_s8, [#allocation6], %s539_s26, %s539_s26, %s540_s27  }
   0xb   :  { %532 = dma.done.wait [#allocation3], 1024  }
   0xc   :  { %533 = vsyncadd [#allocation3], 4294966272 }
   0xd   :  { %534 = dma.done.wait [#allocation6], 18432  }
   0xe   :  { %535 = vsyncadd [#allocation6], 4294948864  ;;  %v121_v0 = vld [vmem:[#allocation5 + $0x178] sm:$0xff]  ;;  %v120_v2 = vld [vmem:[#allocation5 + $0x170] sm:$0xff]  ;;  %s543_s10 = smov [#allocation8]   ;;  %s417_s14 = sshll.u32 %s597_s5, 4  ;;  %s418_s14 = int_to_ptr.hbm [resolvable:$true] %s417_s14 }
   0xf   :  { %v89_v1 = vld [vmem:[#allocation5 + $0x78] sm:$0xff]  ;;  %246 = vmatpush.msra.mxu2 %v121_v0  ;;  %v88_v4 = vld [vmem:[#allocation5 + $0x70] sm:$0xff]  ;;  %v119_v6 = vld [vmem:[#allocation5 + $0x168] sm:$0xff]  ;;  %s415_s11 = sshll.u32 %s543_s10, 4  ;;  %s416_s11 = int_to_ptr.vmem [resolvable:$true] %s415_s11 }
  0x10   :  { %206 = vmatpush.msra.mxu0 %v89_v1  ;;  %v137_v3 = vld [vmem:[#allocation5 + $0x1f8] sm:$0xff]  ;;  %v136_v7 = vld [vmem:[#allocation5 + $0x1f0] sm:$0xff]  ;;  %v87_v8 = vld [vmem:[#allocation5 + $0x68] sm:$0xff] }
  0x11   :  { %v105_v5 = vld [vmem:[#allocation5 + $0xf8] sm:$0xff]  ;;  %266 = vmatpush.msra.mxu3 %v137_v3  ;;  %247 = vmatpush.msra.mxu2 %v120_v2  ;;  %v104_v9 = vld [vmem:[#allocation5 + $0xf0] sm:$0xff]  ;;  %v135_v10 = vld [vmem:[#allocation5 + $0x1e8] sm:$0xff] }
  0x12   :  { %226 = vmatpush.msra.mxu1 %v105_v5  ;;  %207 = vmatpush.msra.mxu0 %v88_v4  ;;  %v118_v11 = vld [vmem:[#allocation5 + $0x160] sm:$0xff]  ;;  %v103_v13 = vld [vmem:[#allocation5 + $0xe8] sm:$0xff]  ;;  %v117_v16 = vld [vmem:[#allocation5 + $0x158] sm:$0xff] }
  0x13   :  { %267 = vmatpush.msra.mxu3 %v136_v7  ;;  %v86_v12 = vld [vmem:[#allocation5 + $0x60] sm:$0xff]  ;;  %248 = vmatpush.msra.mxu2 %v119_v6  ;;  %v85_v17 = vld [vmem:[#allocation5 + $0x58] sm:$0xff]  ;;  %v116_v20 = vld [vmem:[#allocation5 + $0x150] sm:$0xff] }
  0x14   :  { %227 = vmatpush.msra.mxu1 %v104_v9  ;;  %208 = vmatpush.msra.mxu0 %v87_v8  ;;  %v134_v14 = vld [vmem:[#allocation5 + $0x1e0] sm:$0xff]  ;;  %v133_v18 = vld [vmem:[#allocation5 + $0x1d8] sm:$0xff]  ;;  %v84_v21 = vld [vmem:[#allocation5 + $0x50] sm:$0xff] }
  0x15   :  { %v102_v15 = vld [vmem:[#allocation5 + $0xe0] sm:$0xff]  ;;  %268 = vmatpush.msra.mxu3 %v135_v10  ;;  %249 = vmatpush.msra.mxu2 %v118_v11  ;;  %v101_v19 = vld [vmem:[#allocation5 + $0xd8] sm:$0xff]  ;;  %v132_v22 = vld [vmem:[#allocation5 + $0x1d0] sm:$0xff] }
  0x16   :  { %228 = vmatpush.msra.mxu1 %v103_v13  ;;  %209 = vmatpush.msra.mxu0 %v86_v12  ;;  %v100_v23 = vld [vmem:[#allocation5 + $0xd0] sm:$0xff]  ;;  %v115_v24 = vld [vmem:[#allocation5 + $0x148] sm:$0xff]  ;;  %v114_v28 = vld [vmem:[#allocation5 + $0x140] sm:$0xff] }
  0x17   :  { %269 = vmatpush.msra.mxu3 %v134_v14  ;;  %250 = vmatpush.msra.mxu2 %v117_v16  ;;  %v83_v25 = vld [vmem:[#allocation5 + $0x48] sm:$0xff]  ;;  %v82_v29 = vld [vmem:[#allocation5 + $0x40] sm:$0xff]  ;;  %v113_v32 = vld [vmem:[#allocation5 + $0x138] sm:$0xff] }
  0x18   :  { %229 = vmatpush.msra.mxu1 %v102_v15  ;;  %210 = vmatpush.msra.mxu0 %v85_v17  ;;  %v131_v26 = vld [vmem:[#allocation5 + $0x1c8] sm:$0xff]  ;;  %v130_v30 = vld [vmem:[#allocation5 + $0x1c0] sm:$0xff]  ;;  %v81_v33 = vld [vmem:[#allocation5 + $0x38] sm:$0xff] }
  0x19   :  { %270 = vmatpush.msra.mxu3 %v133_v18  ;;  %251 = vmatpush.msra.mxu2 %v116_v20  ;;  %v99_v27 = vld [vmem:[#allocation5 + $0xc8] sm:$0xff]  ;;  %v98_v31 = vld [vmem:[#allocation5 + $0xc0] sm:$0xff]  ;;  %v129_v34 = vld [vmem:[#allocation5 + $0x1b8] sm:$0xff] }
  0x1a   :  { %230 = vmatpush.msra.mxu1 %v101_v19  ;;  %211 = vmatpush.msra.mxu0 %v84_v21  ;;  %v97_v35 = vld [vmem:[#allocation5 + $0xb8] sm:$0xff]  ;;  %v112_v36 = vld [vmem:[#allocation5 + $0x130] sm:$0xff]  ;;  %v111_v40 = vld [vmem:[#allocation5 + $0x128] sm:$0xff] }
  0x1b   :  { %271 = vmatpush.msra.mxu3 %v132_v22  ;;  %252 = vmatpush.msra.mxu2 %v115_v24  ;;  %v80_v37 = vld [vmem:[#allocation5 + $0x30] sm:$0xff]  ;;  %v79_v41 = vld [vmem:[#allocation5 + $0x28] sm:$0xff]  ;;  %v110_v44 = vld [vmem:[#allocation5 + $0x120] sm:$0xff] }
  0x1c   :  { %231 = vmatpush.msra.mxu1 %v100_v23  ;;  %212 = vmatpush.msra.mxu0 %v83_v25  ;;  %v128_v38 = vld [vmem:[#allocation5 + $0x1b0] sm:$0xff]  ;;  %v127_v42 = vld [vmem:[#allocation5 + $0x1a8] sm:$0xff]  ;;  %v78_v45 = vld [vmem:[#allocation5 + $0x20] sm:$0xff] }
  0x1d   :  { %272 = vmatpush.msra.mxu3 %v131_v26  ;;  %253 = vmatpush.msra.mxu2 %v114_v28  ;;  %v96_v39 = vld [vmem:[#allocation5 + $0xb0] sm:$0xff]  ;;  %v95_v43 = vld [vmem:[#allocation5 + $0xa8] sm:$0xff]  ;;  %v126_v46 = vld [vmem:[#allocation5 + $0x1a0] sm:$0xff] }
  0x1e   :  { %232 = vmatpush.msra.mxu1 %v99_v27  ;;  %213 = vmatpush.msra.mxu0 %v82_v29  ;;  %v94_v47 = vld [vmem:[#allocation5 + $0xa0] sm:$0xff]  ;;  %v109_v48 = vld [vmem:[#allocation5 + $0x118] sm:$0xff]  ;;  %v108_v52 = vld [vmem:[#allocation5 + $0x110] sm:$0xff] }
  0x1f   :  { %273 = vmatpush.msra.mxu3 %v130_v30  ;;  %254 = vmatpush.msra.mxu2 %v113_v32  ;;  %v77_v49 = vld [vmem:[#allocation5 + $0x18] sm:$0xff]  ;;  %v76_v53 = vld [vmem:[#allocation5 + $0x10] sm:$0xff]  ;;  %v107_v56 = vld [vmem:[#allocation5 + $0x108] sm:$0xff] }
  0x20   :  { %233 = vmatpush.msra.mxu1 %v98_v31  ;;  %214 = vmatpush.msra.mxu0 %v81_v33  ;;  %v125_v50 = vld [vmem:[#allocation5 + $0x198] sm:$0xff]  ;;  %v124_v54 = vld [vmem:[#allocation5 + $0x190] sm:$0xff]  ;;  %v75_v57 = vld [vmem:[#allocation5 + $0x8] sm:$0xff] }
  0x21   :  { %274 = vmatpush.msra.mxu3 %v129_v34  ;;  %255 = vmatpush.msra.mxu2 %v112_v36  ;;  %v93_v51 = vld [vmem:[#allocation5 + $0x98] sm:$0xff]  ;;  %v92_v55 = vld [vmem:[#allocation5 + $0x90] sm:$0xff]  ;;  %v123_v58 = vld [vmem:[#allocation5 + $0x188] sm:$0xff] }
  0x22   :  { %234 = vmatpush.msra.mxu1 %v97_v35  ;;  %215 = vmatpush.msra.mxu0 %v80_v37  ;;  %v91_v59 = vld [vmem:[#allocation5 + $0x88] sm:$0xff]  ;;  %v106_v60 = vld [vmem:[#allocation5 + $0x100] sm:$0xff]  ;;  %v185_v62 = vld [vmem:[#allocation5 + $0x378] sm:$0xff] }
  0x23   :  { %275 = vmatpush.msra.mxu3 %v128_v38  ;;  %256 = vmatpush.msra.mxu2 %v111_v40  ;;  %v74_v61 = vld [vmem:[#allocation5] sm:$0xff]  ;;  %v153_v0 = vld [vmem:[#allocation5 + $0x278] sm:$0xff]  ;;  %v184_v2 = vld [vmem:[#allocation5 + $0x370] sm:$0xff] }
  0x24   :  { %235 = vmatpush.msra.mxu1 %v96_v39  ;;  %216 = vmatpush.msra.mxu0 %v79_v41  ;;  %v122_v63 = vld [vmem:[#allocation5 + $0x180] sm:$0xff]  ;;  %v201_v1 = vld [vmem:[#allocation5 + $0x3f8] sm:$0xff]  ;;  %v152_v4 = vld [vmem:[#allocation5 + $0x270] sm:$0xff] }
  0x25   :  { %276 = vmatpush.msra.mxu3 %v127_v42  ;;  %257 = vmatpush.msra.mxu2 %v110_v44  ;;  %v90_v3 = vld [vmem:[#allocation5 + $0x80] sm:$0xff]  ;;  %v169_v5 = vld [vmem:[#allocation5 + $0x2f8] sm:$0xff]  ;;  %v183_v6 = vld [vmem:[#allocation5 + $0x368] sm:$0xff] }
  0x26   :  { %236 = vmatpush.msra.mxu1 %v95_v43  ;;  %217 = vmatpush.msra.mxu0 %v78_v45  ;;  %v200_v7 = vld [vmem:[#allocation5 + $0x3f0] sm:$0xff]  ;;  %v151_v8 = vld [vmem:[#allocation5 + $0x268] sm:$0xff]  ;;  %v182_v10 = vld [vmem:[#allocation5 + $0x360] sm:$0xff] }
  0x27   :  { %277 = vmatpush.msra.mxu3 %v126_v46  ;;  %258 = vmatpush.msra.mxu2 %v109_v48  ;;  %v168_v9 = vld [vmem:[#allocation5 + $0x2f0] sm:$0xff]  ;;  %v199_v11 = vld [vmem:[#allocation5 + $0x3e8] sm:$0xff]  ;;  %v150_v12 = vld [vmem:[#allocation5 + $0x260] sm:$0xff] }
  0x28   :  { %237 = vmatpush.msra.mxu1 %v94_v47  ;;  %218 = vmatpush.msra.mxu0 %v77_v49  ;;  %v167_v13 = vld [vmem:[#allocation5 + $0x2e8] sm:$0xff]  ;;  %v181_v14 = vld [vmem:[#allocation5 + $0x358] sm:$0xff]  ;;  %v198_v15 = vld [vmem:[#allocation5 + $0x3e0] sm:$0xff] }
  0x29   :  { %278 = vmatpush.msra.mxu3 %v125_v50  ;;  %259 = vmatpush.msra.mxu2 %v108_v52  ;;  %v149_v16 = vld [vmem:[#allocation5 + $0x258] sm:$0xff]  ;;  %v166_v17 = vld [vmem:[#allocation5 + $0x2e0] sm:$0xff]  ;;  %v180_v18 = vld [vmem:[#allocation5 + $0x350] sm:$0xff] }
  0x2a   :  { %238 = vmatpush.msra.mxu1 %v93_v51  ;;  %219 = vmatpush.msra.mxu0 %v76_v53  ;;  %v197_v19 = vld [vmem:[#allocation5 + $0x3d8] sm:$0xff]  ;;  %v148_v20 = vld [vmem:[#allocation5 + $0x250] sm:$0xff]  ;;  %v179_v22 = vld [vmem:[#allocation5 + $0x348] sm:$0xff] }
  0x2b   :  { %279 = vmatpush.msra.mxu3 %v124_v54  ;;  %260 = vmatpush.msra.mxu2 %v107_v56  ;;  %v165_v21 = vld [vmem:[#allocation5 + $0x2d8] sm:$0xff]  ;;  %v196_v23 = vld [vmem:[#allocation5 + $0x3d0] sm:$0xff]  ;;  %v147_v24 = vld [vmem:[#allocation5 + $0x248] sm:$0xff] }
  0x2c   :  { %239 = vmatpush.msra.mxu1 %v92_v55  ;;  %220 = vmatpush.msra.mxu0 %v75_v57  ;;  %v164_v25 = vld [vmem:[#allocation5 + $0x2d0] sm:$0xff]  ;;  %v178_v26 = vld [vmem:[#allocation5 + $0x340] sm:$0xff]  ;;  %v195_v27 = vld [vmem:[#allocation5 + $0x3c8] sm:$0xff] }
  0x2d   :  { %280 = vmatpush.msra.mxu3 %v123_v58  ;;  %261 = vmatpush.msra.mxu2 %v106_v60  ;;  %v146_v28 = vld [vmem:[#allocation5 + $0x240] sm:$0xff]  ;;  %v163_v29 = vld [vmem:[#allocation5 + $0x2c8] sm:$0xff]  ;;  %v177_v30 = vld [vmem:[#allocation5 + $0x338] sm:$0xff] }
  0x2e   :  { %240 = vmatpush.msra.mxu1 %v91_v59  ;;  %221 = vmatpush.msra.mxu0 %v74_v61  ;;  %v194_v31 = vld [vmem:[#allocation5 + $0x3c0] sm:$0xff]  ;;  %v145_v32 = vld [vmem:[#allocation5 + $0x238] sm:$0xff]  ;;  %v176_v34 = vld [vmem:[#allocation5 + $0x330] sm:$0xff] }
  0x2f   :  { %326 = vmatpush.msrb.mxu2 %v185_v62  ;;  %281 = vmatpush.msra.mxu3 %v122_v63  ;;  %v162_v33 = vld [vmem:[#allocation5 + $0x2c0] sm:$0xff]  ;;  %v193_v35 = vld [vmem:[#allocation5 + $0x3b8] sm:$0xff]  ;;  %v144_v36 = vld [vmem:[#allocation5 + $0x230] sm:$0xff] }
  0x30   :  { %286 = vmatpush.msrb.mxu0 %v153_v0  ;;  %241 = vmatpush.msra.mxu1 %v90_v3  ;;  %v161_v37 = vld [vmem:[#allocation5 + $0x2b8] sm:$0xff]  ;;  %v175_v38 = vld [vmem:[#allocation5 + $0x328] sm:$0xff]  ;;  %v192_v39 = vld [vmem:[#allocation5 + $0x3b0] sm:$0xff] }
  0x31   :  { %346 = vmatpush.msrb.mxu3 %v201_v1  ;;  %327 = vmatpush.msrb.mxu2 %v184_v2  ;;  %v143_v40 = vld [vmem:[#allocation5 + $0x228] sm:$0xff]  ;;  %v160_v41 = vld [vmem:[#allocation5 + $0x2b0] sm:$0xff]  ;;  %v174_v42 = vld [vmem:[#allocation5 + $0x320] sm:$0xff] }
  0x32   :  { %287 = vmatpush.msrb.mxu0 %v152_v4  ;;  %306 = vmatpush.msrb.mxu1 %v169_v5  ;;  %v191_v43 = vld [vmem:[#allocation5 + $0x3a8] sm:$0xff]  ;;  %v68_v44 = vld [vmem:[#allocation2 + $0x10] sm:$0xff]  ;;  %v142_v45 = vld [vmem:[#allocation5 + $0x220] sm:$0xff] }
  0x33   :  { %328 = vmatpush.msrb.mxu2 %v183_v6  ;;  %347 = vmatpush.msrb.mxu3 %v200_v7  ;;  %v159_v46 = vld [vmem:[#allocation5 + $0x2a8] sm:$0xff]  ;;  %v173_v47 = vld [vmem:[#allocation5 + $0x318] sm:$0xff]  ;;  %v190_v48 = vld [vmem:[#allocation5 + $0x3a0] sm:$0xff] }
  0x34   :  { %288 = vmatpush.msrb.mxu0 %v151_v8  ;;  %307 = vmatpush.msrb.mxu1 %v168_v9  ;;  %v66_v49 = vld [vmem:[#allocation2] sm:$0xff]  ;;  %v69_v50 = vld [vmem:[#allocation2 + $0x18] sm:$0xff]  ;;  %v172_v53 = vld [vmem:[#allocation5 + $0x310] sm:$0xff] }
  0x35   :  { %329 = vmatpush.msrb.mxu2 %v182_v10  ;;  %348 = vmatpush.msrb.mxu3 %v199_v11  ;;  %v141_v51 = vld [vmem:[#allocation5 + $0x218] sm:$0xff]  ;;  %v158_v52 = vld [vmem:[#allocation5 + $0x2a0] sm:$0xff]  ;;  %v67_v55 = vld [vmem:[#allocation2 + $0x8] sm:$0xff] }
  0x36   :  { %289 = vmatpush.msrb.mxu0 %v150_v12  ;;  %308 = vmatpush.msrb.mxu1 %v167_v13  ;;  %v189_v54 = vld [vmem:[#allocation5 + $0x398] sm:$0xff]  ;;  %v140_v56 = vld [vmem:[#allocation5 + $0x210] sm:$0xff]  ;;  %v171_v58 = vld [vmem:[#allocation5 + $0x308] sm:$0xff] }
  0x37   :  { %330 = vmatpush.msrb.mxu2 %v181_v14  ;;  %349 = vmatpush.msrb.mxu3 %v198_v15  ;;  %v157_v57 = vld [vmem:[#allocation5 + $0x298] sm:$0xff]  ;;  %v188_v59 = vld [vmem:[#allocation5 + $0x390] sm:$0xff]  ;;  %v139_v60 = vld [vmem:[#allocation5 + $0x208] sm:$0xff] }
  0x38   :  { %290 = vmatpush.msrb.mxu0 %v149_v16  ;;  %309 = vmatpush.msrb.mxu1 %v166_v17  ;;  %v156_v61 = vld [vmem:[#allocation5 + $0x290] sm:$0xff]  ;;  %v170_v62 = vld [vmem:[#allocation5 + $0x300] sm:$0xff]  ;;  %v187_v63 = vld [vmem:[#allocation5 + $0x388] sm:$0xff] }
  0x39   :  { %331 = vmatpush.msrb.mxu2 %v180_v18  ;;  %350 = vmatpush.msrb.mxu3 %v197_v19  ;;  %v72_v0 = vld [vmem:[#allocation2 + $0x30] sm:$0xff]  ;;  %v138_v1 = vld [vmem:[#allocation5 + $0x200] sm:$0xff]  ;;  %v155_v2 = vld [vmem:[#allocation5 + $0x288] sm:$0xff] }
  0x3a   :  { %291 = vmatpush.msrb.mxu0 %v148_v20  ;;  %310 = vmatpush.msrb.mxu1 %v165_v21  ;;  %v186_v3 = vld [vmem:[#allocation5 + $0x380] sm:$0xff]  ;;  %v73_v5 = vld [vmem:[#allocation2 + $0x38] sm:$0xff]  ;;  %v71_v8 = vld [vmem:[#allocation2 + $0x28] sm:$0xff] }
  0x3b   :  { %332 = vmatpush.msrb.mxu2 %v179_v22  ;;  %351 = vmatpush.msrb.mxu3 %v196_v23  ;;  %v70_v4 = vld [vmem:[#allocation2 + $0x20] sm:$0xff]  ;;  %v384_v7 = vld [vmem:[#allocation7 + $0x78] sm:$0xff]  ;;  %v383_v9 = vld [vmem:[#allocation7 + $0x70] sm:$0xff] }
  0x3c   :  { %292 = vmatpush.msrb.mxu0 %v147_v24  ;;  %311 = vmatpush.msrb.mxu1 %v164_v25  ;;  %v154_v6 = vld [vmem:[#allocation5 + $0x280] sm:$0xff]  ;;  %v382_v10 = vld [vmem:[#allocation7 + $0x68] sm:$0xff]  ;;  %v380_v12 = vld [vmem:[#allocation7 + $0x58] sm:$0xff] }
  0x3d   :  { %333 = vmatpush.msrb.mxu2 %v178_v26  ;;  %352 = vmatpush.msrb.mxu3 %v195_v27  ;;  %v381_v11 = vld [vmem:[#allocation7 + $0x60] sm:$0xff]  ;;  %v379_v13 = vld [vmem:[#allocation7 + $0x50] sm:$0xff]  ;;  %v378_v14 = vld [vmem:[#allocation7 + $0x48] sm:$0xff] }
  0x3e   :  { %293 = vmatpush.msrb.mxu0 %v146_v28  ;;  %312 = vmatpush.msrb.mxu1 %v163_v29  ;;  %v377_v15 = vld [vmem:[#allocation7 + $0x40] sm:$0xff]  ;;  %v376_v16 = vld [vmem:[#allocation7 + $0x38] sm:$0xff]  ;;  %v375_v17 = vld [vmem:[#allocation7 + $0x30] sm:$0xff] }
  0x3f   :  { %334 = vmatpush.msrb.mxu2 %v177_v30  ;;  %353 = vmatpush.msrb.mxu3 %v194_v31  ;;  %v374_v18 = vld [vmem:[#allocation7 + $0x28] sm:$0xff]  ;;  %v373_v19 = vld [vmem:[#allocation7 + $0x20] sm:$0xff]  ;;  %v372_v20 = vld [vmem:[#allocation7 + $0x18] sm:$0xff] }
  0x40   :  { %294 = vmatpush.msrb.mxu0 %v145_v32  ;;  %313 = vmatpush.msrb.mxu1 %v162_v33  ;;  %v371_v21 = vld [vmem:[#allocation7 + $0x10] sm:$0xff]  ;;  %v370_v22 = vld [vmem:[#allocation7 + $0x8] sm:$0xff]  ;;  %v369_v23 = vld [vmem:[#allocation7] sm:$0xff] }
  0x41   :  { %335 = vmatpush.msrb.mxu2 %v176_v34  ;;  %354 = vmatpush.msrb.mxu3 %v193_v35  ;;  %v434_v24 = vld [vmem:[%s594_s2] ss:$0 sm:$0xff] }
  0x42   :  { %295 = vmatpush.msrb.mxu0 %v144_v36  ;;  %314 = vmatpush.msrb.mxu1 %v161_v37 }
  0x43   :  { %336 = vmatpush.msrb.mxu2 %v175_v38  ;;  %355 = vmatpush.msrb.mxu3 %v192_v39 }
  0x44   :  { %296 = vmatpush.msrb.mxu0 %v143_v40  ;;  %315 = vmatpush.msrb.mxu1 %v160_v41 }
  0x45   :  { %337 = vmatpush.msrb.mxu2 %v174_v42  ;;  %356 = vmatpush.msrb.mxu3 %v191_v43  ;;  %v435_v43 = vld [vmem:[%s596_s4] ss:$0 sm:$0xff] }
  0x46   :  { %262 = vmatmul.f32.vlgmr.msra.gmra.mxu2 %v68_v44  ;;  %297 = vmatpush.msrb.mxu0 %v142_v45 }
  0x47   :  { %316 = vmatpush.msrb.mxu1 %v159_v46  ;;  %338 = vmatpush.msrb.mxu2 %v173_v47 }
  0x48   :  { %357 = vmatpush.msrb.mxu3 %v190_v48  ;;  %222 = vmatmul.f32.vlgmr.msra.gmra.mxu0 %v66_v49 }
  0x49   :  { %282 = vmatmul.f32.vlgmr.msra.gmra.mxu3 %v69_v50  ;;  %298 = vmatpush.msrb.mxu0 %v141_v51 }
  0x4a   :  { %317 = vmatpush.msrb.mxu1 %v158_v52  ;;  %339 = vmatpush.msrb.mxu2 %v172_v53 }
  0x4b   :  { %358 = vmatpush.msrb.mxu3 %v189_v54  ;;  %242 = vmatmul.f32.vlgmr.msra.gmra.mxu1 %v67_v55 }
  0x4c   :  { %299 = vmatpush.msrb.mxu0 %v140_v56  ;;  %318 = vmatpush.msrb.mxu1 %v157_v57 }
  0x4d   :  { %340 = vmatpush.msrb.mxu2 %v171_v58  ;;  %359 = vmatpush.msrb.mxu3 %v188_v59 }
  0x4e   :  { %300 = vmatpush.msrb.mxu0 %v139_v60  ;;  %319 = vmatpush.msrb.mxu1 %v156_v61 }
  0x4f   :  { %341 = vmatpush.msrb.mxu2 %v170_v62  ;;  %360 = vmatpush.msrb.mxu3 %v187_v63 }
  0x50   :  { %342 = vmatmul.f32.vlgmr.msrb.gmra.mxu2 %v72_v0  ;;  %301 = vmatpush.msrb.mxu0 %v138_v1 }
  0x51   :  { %320 = vmatpush.msrb.mxu1 %v155_v2  ;;  %361 = vmatpush.msrb.mxu3 %v186_v3 }
  0x52   :  { %302 = vmatmul.f32.vlgmr.msrb.gmra.mxu0 %v70_v4  ;;  %362 = vmatmul.f32.vlgmr.msrb.gmra.mxu3 %v73_v5 }
  0x53   :  { %321 = vmatpush.msrb.mxu1 %v154_v6  ;;  %389 = vmatpush.msra.mxu0 %v384_v7 }
  0x54   :  { %322 = vmatmul.f32.vlgmr.msrb.gmra.mxu1 %v71_v8 }
  0x55   :  { %390 = vmatpush.msra.mxu0 %v383_v9 }
  0x57   :  { %391 = vmatpush.msra.mxu0 %v382_v10 }
  0x59   :  { %392 = vmatpush.msra.mxu0 %v381_v11 }
  0x5b   :  { %393 = vmatpush.msra.mxu0 %v380_v12 }
  0x5d   :  { %394 = vmatpush.msra.mxu0 %v379_v13 }
  0x5f   :  { %395 = vmatpush.msra.mxu0 %v378_v14 }
  0x61   :  { %396 = vmatpush.msra.mxu0 %v377_v15 }
  0x63   :  { %397 = vmatpush.msra.mxu0 %v376_v16 }
  0x65   :  { %398 = vmatpush.msra.mxu0 %v375_v17 }
  0x67   :  { %399 = vmatpush.msra.mxu0 %v374_v18 }
  0x69   :  { %400 = vmatpush.msra.mxu0 %v373_v19 }
  0x6b   :  { %401 = vmatpush.msra.mxu0 %v372_v20 }
  0x6d   :  { %402 = vmatpush.msra.mxu0 %v371_v21 }
  0x6f   :  { %403 = vmatpush.msra.mxu0 %v370_v22 }
  0x71   :  { %404 = vmatpush.msra.mxu0 %v369_v23 }
  0xc5   :  { %v223_v25 = vpop.f32.mrf.mxu0 }
  0xc6   :  { %v224_v26 = vadd.f32 %v434_v24, %v223_v25 }
  0xc8   :  { %v243_v27 = vpop.f32.mrf.mxu1 }
  0xc9   :  { %v244_v28 = vadd.f32 %v243_v27, %v224_v26  ;;  %v263_v29 = vpop.f32.mrf.mxu2 }
  0xcb   :  { %v264_v30 = vadd.f32 %v263_v29, %v244_v28 }
  0xcc   :  { %v283_v31 = vpop.f32.mrf.mxu3 }
  0xcd   :  { %v284_v32 = vadd.f32 %v283_v31, %v264_v30 }
  0xcf   :  { %v303_v33 = vpop.f32.mrf.mxu0 }
  0xd0   :  { %v304_v34 = vadd.f32 %v303_v33, %v284_v32 }
  0xd1   :  { %v323_v35 = vpop.f32.mrf.mxu1 }
  0xd2   :  { %v324_v36 = vadd.f32 %v323_v35, %v304_v34 }
  0xd3   :  { %v343_v37 = vpop.f32.mrf.mxu2 }
  0xd4   :  { %v344_v38 = vadd.f32 %v343_v37, %v324_v36 }
  0xd5   :  { %v363_v39 = vpop.f32.mrf.mxu3 }
  0xd6   :  { %v364_v40 = vadd.f32 %v363_v39, %v344_v38 }
  0xd8   :  { %vm366_vm0 = vcmp.gt.f32.partialorder %v364_v40, 0.0  ;;  %v367_v41 = vmul.f32 0.01, %v364_v40 }
  0xda   :  { %v368_v42 = vsel %vm366_vm0, %v364_v40, %v367_v41 }
  0xdb   :  { %405 = vmatmul.f32.vlgmr.msra.gmra.mxu0 %v368_v42 }
 0x158   :  { %v406_v44 = vpop.f32.mrf.mxu0 }
 0x159   :  { %v407_v45 = vadd.f32 %v435_v43, %v406_v44 }
 0x15b   :  { %409 = vst [vmem:[#allocation8] sm:$0xff] %v407_v45 }
 0x15c   :  { %420 = dma.vmem_to_hbm [thread:$0]  %s416_s11, 128, %s418_s14, [#allocation4]  }
 0x15d   :  { %536 = dma.done.wait [#allocation4], 128  }
 0x15e   :  { %537 = vsyncadd [#allocation4], 4294967168 }
 0x15f   :  { %425 = vsyncpa [#allocation3], 1 }
 0x160   :  { %426 = vsyncpa [#allocation6], 1 }
 0x161   :  { %427 = vsyncpa [#allocation4], 1 }

</bundles_post_ra>
